<compile_context>
chip_gen: v5e
topology: v5e:2x2
jax: 0.10.0
libtpu: 0.0.40
codegen_flags: <defaults>
</compile_context>

<pallas_src>
import jax
import jax.numpy as jnp
import numpy as np
from jax.experimental import pallas as pl
from jax.experimental.pallas import tpu as pltpu


def _pick_row_tile(n, target):
    """Largest multiple-of-8 divisor of n that is <= target (or n itself)."""
    if n <= target:
        return n
    best = None
    t = 8
    while t <= target:
        if n % t == 0:
            best = t
        t += 8
    return best if best is not None else n   # fall back to a single full block


def dss_linear_stats_kernel(x_ref, w_ref, b_ref, y_ref, stats_ref):
    """y = x2 @ Wbig + b (one MXU matmul, K = R*Din) + per-tile BN partials."""
    xf = x_ref[...].astype(jnp.float32)                                # (T, R*Din)
    y = jnp.dot(xf, w_ref[...], preferred_element_type=jnp.float32) + b_ref[...]
    y_ref[...] = y.astype(y_ref.dtype)                                 # (T, R*Dout)

    # Per-tile BatchNorm partial statistics (sum / sum-of-squares per column).
    ssum = jnp.sum(y, axis=0, keepdims=True)                           # (1, R*Dout)
    ssq = jnp.sum(y * y, axis=0, keepdims=True)                        # (1, R*Dout)
    stats_ref[0] = jnp.concatenate([ssum, ssq], axis=0)                # (2, R*Dout)


def bn_affine_kernel(y_ref, scale_ref, shift_ref, o_ref):
    o_ref[...] = (y_ref[...].astype(jnp.float32) * scale_ref[...]
                  + shift_ref[...]).astype(o_ref.dtype)


def dss_conv_excl(vfts, w1, b1, w2, b2, gamma, beta, *,
                  dss_aggr="sum", eps=1e-5,
                  rows_per_tile=512, rows_per_tile_bn=2048):
    N, R, Din = vfts.shape
    Dout = w1.shape[0]
    assert dss_aggr in ("sum", "mean")
    if dss_aggr == "mean":
        assert R >= 2, "dss_aggr='mean' requires at least two relations"
    excl_scale = 1.0 if dss_aggr == "sum" else 1.0 / (R - 1)

    K = R * Din          # fused contraction width (lane dim of x2)
    F = R * Dout         # fused output width (lane dim of y2)
    M = N * R            # BatchNorm batch size

    # Fold the exclusive-relation aggregation into a single (K, F) weight:
    #   Wbig[(r', i), (r, j)] = W1[j, i] if r' == r else excl_scale * W2[j, i]
    eye_r = jnp.eye(R, dtype=jnp.float32)
    wbig = (jnp.kron(eye_r, w1.T.astype(jnp.float32))
            + jnp.kron(excl_scale * (1.0 - eye_r), w2.T.astype(jnp.float32)))
    bbig = jnp.tile((b1 + b2).astype(jnp.float32), R).reshape(1, F)

    # Free (contiguous) reshape: relation+feature dims map to TPU lanes.
    x2 = vfts.reshape(N, K)
    y_dtype = vfts.dtype

    tr = _pick_row_tile(N, rows_per_tile)
    grid1 = N // tr

    # ---- Pass 1: fused DSS linear + per-tile BN partial stats ---------------
    y2, stats = pl.pallas_call(
        dss_linear_stats_kernel,
        out_shape=(jax.ShapeDtypeStruct((N, F), y_dtype),
                   jax.ShapeDtypeStruct((grid1, 2, F), jnp.float32)),
        grid_spec=pltpu.PrefetchScalarGridSpec(
            num_scalar_prefetch=0,
            grid=(grid1,),
            in_specs=[
                pl.BlockSpec((tr, K), lambda i: (i, 0)),
                pl.BlockSpec((K, F), lambda i: (0, 0)),
                pl.BlockSpec((1, F), lambda i: (0, 0)),
            ],
            out_specs=[
                pl.BlockSpec((tr, F), lambda i: (i, 0)),
                pl.BlockSpec((1, 2, F), lambda i: (i, 0, 0)),
            ],
        ),
        compiler_params=pltpu.CompilerParams(
            dimension_semantics=("parallel",)),
    )(x2, wbig, bbig)

    # Finalize BN statistics (tiny per-feature math; plain JAX glue).
    col_sum = jnp.sum(stats[:, 0, :], axis=0).reshape(R, Dout)
    col_ssq = jnp.sum(stats[:, 1, :], axis=0).reshape(R, Dout)
    feat_sum = jnp.sum(col_sum, axis=0)
    feat_ssq = jnp.sum(col_ssq, axis=0)
    mean = feat_sum / M
    var = feat_ssq / M - mean * mean          # biased variance (training-mode BN)
    invstd = jax.lax.rsqrt(var + eps)
    scale = gamma.astype(jnp.float32) * invstd
    shift = beta.astype(jnp.float32) - mean * scale
    scale2 = jnp.tile(scale, R).reshape(1, F)
    shift2 = jnp.tile(shift, R).reshape(1, F)

    trb = _pick_row_tile(N, rows_per_tile_bn)

    # ---- Pass 2: lane-dense (128-wide) BatchNorm affine transform -----------
    out2 = pl.pallas_call(
        bn_affine_kernel,
        out_shape=jax.ShapeDtypeStruct((N, F), vfts.dtype),
        grid_spec=pltpu.PrefetchScalarGridSpec(
            num_scalar_prefetch=0,
            grid=(N // trb,),
            in_specs=[
                pl.BlockSpec((trb, F), lambda i: (i, 0)),
                pl.BlockSpec((1, F), lambda i: (0, 0)),
                pl.BlockSpec((1, F), lambda i: (0, 0)),
            ],
            out_specs=pl.BlockSpec((trb, F), lambda i: (i, 0)),
        ),
        compiler_params=pltpu.CompilerParams(
            dimension_semantics=("parallel",)),
    )(y2, scale2, shift2)

    return out2.reshape(N, R, Dout)


def reference(vfts, w1, b1, w2, b2, gamma, beta, *, dss_aggr="sum", eps=1e-5):
    """Pure-JAX reference matching the PyTorch forward (training-mode BN)."""
    N, R, _ = vfts.shape
    s = jnp.sum(vfts, axis=1, keepdims=True)
    excl = s - vfts
    if dss_aggr == "mean":
        excl = excl / (R - 1)
    hi = jax.lax.Precision.HIGHEST
    y = (jnp.einsum("nrd,od->nro", vfts, w1, precision=hi) + b1
         + jnp.einsum("nrd,od->nro", excl, w2, precision=hi) + b2)
    yf = y.reshape(N * R, -1)
    mean = jnp.mean(yf, axis=0)
    var = jnp.mean((yf - mean) ** 2, axis=0)
    yn = (yf - mean) * jax.lax.rsqrt(var + eps) * gamma + beta
    return yn.reshape(N, R, -1)


if __name__ == "__main__":
    # Small shapes consistent with the module: N nodes, R relations, Din -> Dout.
    N, R, Din, Dout = 1024, 4, 32, 32

    key = jax.random.PRNGKey(0)
    k_x, k_w1, k_w2, k_b1, k_b2 = jax.random.split(key, 5)

    vfts = jax.random.normal(k_x, (N, R, Din), dtype=jnp.float32)

    # Deterministic (glorot-ish) parameter init matching the module's shapes.
    lim = float(np.sqrt(6.0 / (Din + Dout)))
    w1 = jax.random.uniform(k_w1, (Dout, Din), jnp.float32, -lim, lim)
    w2 = jax.random.uniform(k_w2, (Dout, Din), jnp.float32, -lim, lim)
    b1 = 0.1 * jax.random.normal(k_b1, (Dout,), dtype=jnp.float32)
    b2 = 0.1 * jax.random.normal(k_b2, (Dout,), dtype=jnp.float32)
    gamma = jnp.ones((Dout,), jnp.float32)   # BatchNorm1d default affine init
    beta = jnp.zeros((Dout,), jnp.float32)

    # Run 1: default (large) tiles, sum aggregation.
    out = dss_conv_excl(vfts, w1, b1, w2, b2, gamma, beta, dss_aggr="sum")
    out = jax.block_until_ready(out)
    ref = jax.block_until_ready(
        reference(vfts, w1, b1, w2, b2, gamma, beta, dss_aggr="sum"))
    assert out.shape == (N, R, Dout)
    np.testing.assert_allclose(np.asarray(out), np.asarray(ref),
                               rtol=1e-4, atol=1e-4)

    # Run 2: smaller tiles (exercises multi-step grids), mean aggregation.
    out = dss_conv_excl(vfts, w1, b1, w2, b2, gamma, beta, dss_aggr="mean",
                        rows_per_tile=128, rows_per_tile_bn=256)
    out = jax.block_until_ready(out)
    ref = jax.block_until_ready(
        reference(vfts, w1, b1, w2, b2, gamma, beta, dss_aggr="mean"))
    assert out.shape == (N, R, Dout)
    np.testing.assert_allclose(np.asarray(out), np.asarray(ref),
                               rtol=1e-4, atol=1e-4)

    print("KERNEL_OK")
</pallas_src>

<mosaic_0001>
module attributes {stable_mosaic.version = 11 : i64} {
  func.func @dss_linear_stats_kernel(%arg0: i32, %arg1: memref<512x128xf32, #tpu.memory_space<vmem>>, %arg2: memref<128x128xf32, #tpu.memory_space<vmem>>, %arg3: memref<1x128xf32, #tpu.memory_space<vmem>>, %arg4: memref<512x128xf32, #tpu.memory_space<vmem>>, %arg5: memref<1x2x128xf32, #tpu.memory_space<vmem>>) attributes {dimension_semantics = [#tpu.dimension_semantics<parallel>], iteration_bounds = array<i64: 2>, scalar_prefetch = 0 : i64, scratch_operands = 0 : i64, tpu.core_type = #tpu.core_type<tc>, window_params = [{transform_indices = @transform_0, window_bounds = array<i64: 512, 128>}, {pipeline_mode = #tpu.pipeline_mode<synchronous>, transform_indices = @transform_1, window_bounds = array<i64: 128, 128>}, {pipeline_mode = #tpu.pipeline_mode<synchronous>, transform_indices = @transform_2, window_bounds = array<i64: 1, 128>}, {transform_indices = @transform_3, window_bounds = array<i64: 512, 128>}, {transform_indices = @transform_4, window_bounds = array<i64: 1, 2, 128>}]} {
    %c0 = arith.constant 0 : index
    %c0_0 = arith.constant 0 : index
    %0 = vector.load %arg1[%c0, %c0_0] : memref<512x128xf32, #tpu.memory_space<vmem>>, vector<512x128xf32>
    %c0_1 = arith.constant 0 : index
    %c0_2 = arith.constant 0 : index
    %1 = vector.load %arg2[%c0_1, %c0_2] : memref<128x128xf32, #tpu.memory_space<vmem>>, vector<128x128xf32>
    %cst = arith.constant dense<0.000000e+00> : vector<512x128xf32>
    %2 = tpu.matmul %0, %1, %cst {dimension_numbers = #tpu.dot_dimension_numbers<[1], [0], [0], [1], [0, 0, 1, 1], [], []>} : vector<512x128xf32>, vector<128x128xf32>, vector<512x128xf32> -> vector<512x128xf32>
    %c0_3 = arith.constant 0 : index
    %c0_4 = arith.constant 0 : index
    %3 = vector.load %arg3[%c0_3, %c0_4] : memref<1x128xf32, #tpu.memory_space<vmem>>, vector<1x128xf32>
    %4 = vector.broadcast %3 : vector<1x128xf32> to vector<512x128xf32>
    %5 = arith.addf %2, %4 : vector<512x128xf32>
    %c0_5 = arith.constant 0 : index
    %c0_6 = arith.constant 0 : index
    %6 = vector.load %arg4[%c0_5, %c0_6] : memref<512x128xf32, #tpu.memory_space<vmem>>, vector<512x128xf32>
    tpu.vector_store %arg4[%c0_5, %c0_6], %5 {strides = array<i32>} : memref<512x128xf32, #tpu.memory_space<vmem>>, vector<512x128xf32>,
    %cst_7 = arith.constant dense<0.000000e+00> : vector<128xf32>
    %7 = vector.multi_reduction <add>, %5, %cst_7 [0] : vector<512x128xf32> to vector<128xf32>
    %8 = vector.shape_cast %7 : vector<128xf32> to vector<1x128xf32>
    %9 = arith.mulf %5, %5 : vector<512x128xf32>
    %cst_8 = arith.constant dense<0.000000e+00> : vector<128xf32>
    %10 = vector.multi_reduction <add>, %9, %cst_8 [0] : vector<512x128xf32> to vector<128xf32>
    %11 = vector.shape_cast %10 : vector<128xf32> to vector<1x128xf32>
    %12 = tpu.concatenate %8, %11 in 0 : vector<1x128xf32>, vector<1x128xf32> -> vector<2x128xf32>
    %c0_9 = arith.constant 0 : index
    %c0_10 = arith.constant 0 : index
    %c0_11 = arith.constant 0 : index
    %13 = vector.load %arg5[%c0_9, %c0_10, %c0_11] : memref<1x2x128xf32, #tpu.memory_space<vmem>>, vector<1x2x128xf32>
    %14 = vector.shape_cast %13 : vector<1x2x128xf32> to vector<2x128xf32>
    %15 = vector.shape_cast %12 : vector<2x128xf32> to vector<1x2x128xf32>
    tpu.vector_store %arg5[%c0_9, %c0_10, %c0_11], %15 {strides = array<i32>} : memref<1x2x128xf32, #tpu.memory_space<vmem>>, vector<1x2x128xf32>,
    return
  }
  func.func @transform_0(%arg0: i32) -> (i32, i32) {
    %c0_i32 = arith.constant 0 : i32
    %c0_i32_0 = arith.constant 0 : i32
    return %arg0, %c0_i32 : i32, i32
  }
  func.func @transform_1(%arg0: i32) -> (i32, i32) {
    %c0_i32 = arith.constant 0 : i32
    %c0_i32_0 = arith.constant 0 : i32
    %c0_i32_1 = arith.constant 0 : i32
    return %c0_i32, %c0_i32_0 : i32, i32
  }
  func.func @transform_2(%arg0: i32) -> (i32, i32) {
    %c0_i32 = arith.constant 0 : i32
    %c0_i32_0 = arith.constant 0 : i32
    %c0_i32_1 = arith.constant 0 : i32
    return %c0_i32, %c0_i32_0 : i32, i32
  }
  func.func @transform_3(%arg0: i32) -> (i32, i32) {
    %c0_i32 = arith.constant 0 : i32
    %c0_i32_0 = arith.constant 0 : i32
    return %arg0, %c0_i32 : i32, i32
  }
  func.func @transform_4(%arg0: i32) -> (i32, i32, i32) {
    %c0_i32 = arith.constant 0 : i32
    %c0_i32_0 = arith.constant 0 : i32
    %c0_i32_1 = arith.constant 0 : i32
    return %arg0, %c0_i32, %c0_i32_0 : i32, i32, i32
  }
}

</mosaic_0001>

<bundles_post_ra>
// kernel: tpu_custom_call.1
= control target key start
LH: loop header
LB: loop body
LE: loop exit
PB: predicated region body
PF: predicated region fallthrough
CT: control target
= control target key end

     0   :  { %10 = vsyncpa [#allocation3], 0  ;;  %s1987_s0 = inlined_call_operand.hbm [shape: f32[1024,128], index: 0, kind: input, shape index: {}]   ;;  %s1988_s1 = inlined_call_operand.hbm [shape: f32[128,128], index: 1, kind: input, shape index: {}]   ;;  %s1989_s2 = inlined_call_operand.vmem [shape: f32[1,128], index: 2, kind: input, shape index: {}]   ;;  %s1990_s3 = inlined_call_operand.hbm [shape: f32[1024,128], index: 3, kind: output, shape index: {0}]   ;;  %s1991_s4 = inlined_call_operand.hbm [shape: f32[2,2,128], index: 4, kind: output, shape index: {1}]  }
   0x1   :  { %12 = vsyncpa [#allocation3 + $0x1], 0 }
   0x2   :  { %13 = vsyncpa [#allocation6], 0 }
   0x3   :  { %14 = vsyncpa [#allocation4], 0 }
   0x4   :  { %16 = vsyncpa [#allocation4 + $0x1], 0 }
   0x5   :  { %17 = vsyncpa [#allocation9], 0 }
   0x6   :  { %19 = vsyncpa [#allocation9 + $0x1], 0  ;;  %s1291_s15 = smov 0   ;;  %s1293_s16 = smov 0  }
   0x7   :  { %s1295_s17 = smov 0   ;;  %s1297_s18 = smov 0  }
   0x8 LB: > { %s1312_s19 = sadd.s32 4294967295, %s1259_s18   ;;  %s961_s20 = sadd.s32 4294967294, %s1259_s18   ;;  %s1259_s18 = sphi %s1297_s18, %s2001_s18   ;;  %s1255_s17 = sphi %s1295_s17, %s2000_s17   ;;  %s1251_s16 = sphi %s1293_s16, %s1999_s16   ;;  %s1247_s15 = sphi %s1291_s15, %s1998_s15  }
   0x9   : > { %p45_p0 = scmp.ne.s32.totalorder %s1251_s16, %s1247_s15  ;;  %p46_p1 = scmp.eq.s32.totalorder %s1312_s19, 0 }
   0xa   : > { %p111_p2 = scmp.eq.s32.totalorder %s1312_s19, 1  ;;  %p117_p3 = scmp.eq.s32.totalorder %s961_s20, 1 }
   0xb   : > { %p1321_p4 = por %p46_p1, %p45_p0  ;;  %p962_p5 = scmp.ge.s32.totalorder %s1259_s18, 1 }
   0xc   : > { %p1326_p6 = por %p117_p3, %p45_p0  ;;  %p150_p7 = scmp.lt.s32.totalorder %s1259_s18, 3 }
   0xd   : > { %s161_s25 = sshll.u32 %s1988_s1, 4  ;;  %s1261_s27 = smov [#allocation5]   ;;  %s162_s25 = int_to_ptr.hbm [resolvable:$true] %s161_s25 }
   0xe   : > { %p1334_p8 = pnand %p962_p5, %p150_p7  ;;  %s163_s28 = sshll.u32 %s1261_s27, 4  ;;  %s164_s28 = int_to_ptr.vmem [resolvable:$true] %s163_s28 }
   0xf   : > { %s1344_s29 = sadd.s32 1, %s1259_s18   ;;  %s1262_s30 = smov 128  }
  0x10   : > { %p1040_p9 = pneg %p1334_p8  ;;  %s1263_s5 = smov 8  }
  0x11   : > { %s29_s6 = ssub.s32 %s1259_s18, %s1344_s29  ;;  %s32_s7 = sadd.s32 1, %s1255_s17 }
  0x12   : > { %p1041_p10 = pnand %p1040_p9, %p46_p1  ;;  %p30_p12 = scmp.eq.s32.totalorder %s29_s6, 0 }
  0x13   : > { %p39_p13 = scmp.ne.s32.totalorder %s1255_s17, %s1251_s16  ;;  %p40_p0 = scmp.eq.s32.totalorder %s1259_s18, 0 }
  0x14   : > { %1043 = dma.hbm_to_vmem [thread:$0]  (!%p1041_p10), %s162_s25, 2048, %s164_s28, [#allocation6], %s1262_s30, %s1262_s30, %s1263_s5  }
  0x15   : > { %s1356_s8 = scalar_select %p30_p12, %s1255_s17, %s32_s7  }
  0x16   : > { %p1360_p3 = por %p111_p2, %p39_p13  ;;  %p1056_p5 = scmp.lt.s32.totalorder %s1259_s18, 2 }
  0x17   : > { %s180_s10 = sand.u32 1, %s1255_s17   ;;  %s980_s11 = sshll.u32 %s1259_s18, 9 }
  0x18   : > { %p41_p7 = por %p40_p0, %p39_p13  ;;  %s965_s12 = sshll.u32 %s180_s10, 9 }
  0x19   : > { %s189_s20 = scalar_lea.hbm %s1987_s0, %s980_s11  ;;  %s184_s24 = scalar_lea.vmem [#allocation2], %s965_s12 }
  0x1a   : > { %s190_s23 = sshll.u32 %s189_s20, 4  ;;  %s192_s25 = sshll.u32 %s184_s24, 4  ;;  %s191_s23 = int_to_ptr.hbm [resolvable:$true] %s190_s23  ;;  %s193_s25 = int_to_ptr.vmem [resolvable:$true] %s192_s25 }
  0x1b   : > { %p1370_p9 = pnand %p1056_p5, %p41_p7  ;;  %s181_s28 = scalar_lea.sflag [#allocation3], %s180_s10 }
  0x1c   : > { %s1127_s6 = sshra.s32 %s191_s23, 4  ;;  %s1134_s12 = scalar_lea.hbm %s1987_s0, 1024  ;;  %s1128_s6 = int_to_ptr.hbm [resolvable:$true] %s1127_s6 }
  0x1d   : > { %s1129_s7 = scalar_lea.hbm %s1128_s6, 512  ;;  %p1131_p10 = pneg %p1370_p9 }
  0x1e   : > { %p1130_p2 = scmp.ne.s32.totalorder %s1128_s6, %s1129_s7  ;;  %p1135_p0 = scmp.lt.s32.totalorder %s1128_s6, %s1987_s0 }
  0x1f   : > { %p1136_p5 = scmp.lt.s32.totalorder %s1134_s12, %s1129_s7 }
  0x20   : > { %p1132_p12 = pnand %p1131_p10, %p1130_p2 }
  0x21   : > { %p1137_p7 = por %p1136_p5, %p1135_p0 }
  0x22   : > { %p1133_p13 = pneg %p1132_p12 }
  0x24   : > { %p1138_p11 = pnand %p1137_p7, %p1133_p13 }
  0x26   : > { %1141 = shalt.err (!%p1138_p11)
}
  0x27   : > { %1047 = dma.hbm_to_vmem [thread:$0]  (!%p1370_p9), %s191_s23, 8192, %s193_s25, %s181_s28, %s1262_s30, %s1262_s30, %s1263_s5  }
  0x28   : > { %204 = sbr.rel (%p1334_p8) target bundleno = 444 (0x1bc), region = 32  ;;  %s1390_s10 = sand.u32 (!%p1334_p8), 1, %s1251_s16  }
  0x29   : > { %s969_s24 = sshll.u32 (!%p1334_p8), %s1390_s10, 9  ;;  %s207_s6 = scalar_lea.sflag (!%p1334_p8), [#allocation3], %s1390_s10 }
  0x2a   : > { %s1396_s7 = scalar_lea.vmem (!%p1334_p8), [#allocation2], %s969_s24 }
  0x2d   : > { %1230 = dma.done.wait (%p1321_p4), %s207_s6, 8192  }
  0x2e   : > { %1232 = vsyncadd (%p1321_p4), %s207_s6, 4294959104 }
  0x2f   : > { %1234 = dma.done.wait (%p46_p1), [#allocation6], 2048  }
  0x30   : > { %1236 = vsyncadd (%p46_p1), [#allocation6], 4294965248  ;;  %v327_v0 = vld [vmem:[#allocation5 + $0x78] sm:$0xff]  ;;  %v326_v1 = vld [vmem:[#allocation5 + $0x70] sm:$0xff]  ;;  %s1471_s30 = scalar_lea.vmem [#allocation7], %s969_s24  ;;  %s981_s5 = sshll.u32 %s1312_s19, 9 }
  0x31   : > { %332 = vmatpush.msra.mxu0 %v327_v0  ;;  %982 = vmatpush.msra.mxu1 %v327_v0  ;;  %v325_v2 = vld [vmem:[#allocation5 + $0x68] sm:$0xff]  ;;  %v324_v3 = vld [vmem:[#allocation5 + $0x60] sm:$0xff]  ;;  %v323_v4 = vld [vmem:[#allocation5 + $0x58] sm:$0xff]  ;;  %s827_s27 = scalar_lea.hbm %s1990_s3, %s981_s5  ;;  %s828_s28 = sshll.u32 %s1471_s30, 4  ;;  %s829_s28 = int_to_ptr.vmem [resolvable:$true] %s828_s28 }
  0x32   : > { %983 = vmatpush.msra.mxu2 %v327_v0  ;;  %984 = vmatpush.msra.mxu3 %v327_v0  ;;  %v322_v5 = vld [vmem:[#allocation5 + $0x50] sm:$0xff]  ;;  %v321_v6 = vld [vmem:[#allocation5 + $0x48] sm:$0xff]  ;;  %v320_v7 = vld [vmem:[#allocation5 + $0x40] sm:$0xff]  ;;  %s830_s11 = sshll.u32 %s827_s27, 4  ;;  %s811_s13 = scalar_lea.sflag [#allocation4], %s1390_s10  ;;  %s831_s11 = int_to_ptr.hbm [resolvable:$true] %s830_s11 }
  0x33   : > { %333 = vmatpush.msra.mxu0 %v326_v1  ;;  %985 = vmatpush.msra.mxu1 %v326_v1  ;;  %v319_v8 = vld [vmem:[#allocation5 + $0x38] sm:$0xff]  ;;  %v318_v9 = vld [vmem:[#allocation5 + $0x30] sm:$0xff]  ;;  %v317_v10 = vld [vmem:[#allocation5 + $0x28] sm:$0xff]  ;;  %s1171_s12 = sshra.s32 %s831_s11, 4  ;;  %s1177_s6 = scalar_lea.hbm %s1990_s3, 1024  ;;  %s1172_s12 = int_to_ptr.hbm [resolvable:$true] %s1171_s12 }
  0x34   : > { %986 = vmatpush.msra.mxu2 %v326_v1  ;;  %987 = vmatpush.msra.mxu3 %v326_v1  ;;  %v316_v11 = vld [vmem:[#allocation5 + $0x20] sm:$0xff]  ;;  %v315_v12 = vld [vmem:[#allocation5 + $0x18] sm:$0xff]  ;;  %v314_v13 = vld [vmem:[#allocation5 + $0x10] sm:$0xff]  ;;  %s1173_s14 = scalar_lea.hbm %s1172_s12, 512  ;;  %p1178_p11 = scmp.lt.s32.totalorder %s1172_s12, %s1990_s3 }
  0x35   : > { %334 = vmatpush.msra.mxu0 %v325_v2  ;;  %988 = vmatpush.msra.mxu1 %v325_v2  ;;  %v313_v14 = vld [vmem:[#allocation5 + $0x8] sm:$0xff]  ;;  %v312_v15 = vld [vmem:[#allocation5] sm:$0xff]  ;;  %v250_v20 = vld [vmem:[%s1396_s7 + $0x10] sm:$0xff]  ;;  %p1174_p1 = scmp.ne.s32.totalorder %s1172_s12, %s1173_s14  ;;  %p1179_p9 = scmp.lt.s32.totalorder %s1177_s6, %s1173_s14 }
  0x36   : > { %989 = vmatpush.msra.mxu2 %v325_v2  ;;  %990 = vmatpush.msra.mxu3 %v325_v2  ;;  %v248_v16 = vld [vmem:[%s1396_s7] sm:$0xff]  ;;  %v249_v18 = vld [vmem:[%s1396_s7 + $0x8] sm:$0xff]  ;;  %v266_v21 = vld [vmem:[%s1396_s7 + $0x90] sm:$0xff] }
  0x37   : > { %335 = vmatpush.msra.mxu0 %v324_v3  ;;  %991 = vmatpush.msra.mxu1 %v324_v3  ;;  %v264_v17 = vld [vmem:[%s1396_s7 + $0x80] sm:$0xff]  ;;  %v265_v19 = vld [vmem:[%s1396_s7 + $0x88] sm:$0xff]  ;;  %v251_v22 = vld [vmem:[%s1396_s7 + $0x18] sm:$0xff]  ;;  %p1175_p4 = pnand %p1174_p1, %p1360_p3  ;;  %p1180_p2 = por %p1179_p9, %p1178_p11 }
  0x38   : > { %992 = vmatpush.msra.mxu2 %v324_v3  ;;  %993 = vmatpush.msra.mxu3 %v324_v3  ;;  %v267_v23 = vld [vmem:[%s1396_s7 + $0x98] sm:$0xff]  ;;  %v280_v24 = vld [vmem:[%s1396_s7 + $0x100] sm:$0xff]  ;;  %v281_v27 = vld [vmem:[%s1396_s7 + $0x108] sm:$0xff] }
  0x39   : > { %336 = vmatpush.msra.mxu0 %v323_v4  ;;  %994 = vmatpush.msra.mxu1 %v323_v4  ;;  %v252_v25 = vld [vmem:[%s1396_s7 + $0x20] sm:$0xff]  ;;  %v253_v28 = vld [vmem:[%s1396_s7 + $0x28] sm:$0xff]  ;;  %v282_v30 = vld [vmem:[%s1396_s7 + $0x110] sm:$0xff]  ;;  %p1176_p8 = pneg %p1175_p4 }
  0x3a   : > { %995 = vmatpush.msra.mxu2 %v323_v4  ;;  %996 = vmatpush.msra.mxu3 %v323_v4  ;;  %v268_v26 = vld [vmem:[%s1396_s7 + $0xa0] sm:$0xff]  ;;  %v269_v29 = vld [vmem:[%s1396_s7 + $0xa8] sm:$0xff]  ;;  %v254_v31 = vld [vmem:[%s1396_s7 + $0x30] sm:$0xff] }
  0x3b   : > { %337 = vmatpush.msra.mxu0 %v322_v5  ;;  %997 = vmatpush.msra.mxu1 %v322_v5  ;;  %v270_v32 = vld [vmem:[%s1396_s7 + $0xb0] sm:$0xff]  ;;  %v283_v33 = vld [vmem:[%s1396_s7 + $0x118] sm:$0xff]  ;;  %v284_v36 = vld [vmem:[%s1396_s7 + $0x120] sm:$0xff]  ;;  %p1181_p10 = pnand %p1180_p2, %p1176_p8 }
  0x3c   : > { %998 = vmatpush.msra.mxu2 %v322_v5  ;;  %999 = vmatpush.msra.mxu3 %v322_v5  ;;  %v255_v34 = vld [vmem:[%s1396_s7 + $0x38] sm:$0xff]  ;;  %v296_v37 = vld [vmem:[%s1396_s7 + $0x180] sm:$0xff]  ;;  %v285_v40 = vld [vmem:[%s1396_s7 + $0x128] sm:$0xff] }
  0x3d   : > { %338 = vmatpush.msra.mxu0 %v321_v6  ;;  %1000 = vmatpush.msra.mxu1 %v321_v6  ;;  %v271_v35 = vld [vmem:[%s1396_s7 + $0xb8] sm:$0xff]  ;;  %v256_v38 = vld [vmem:[%s1396_s7 + $0x40] sm:$0xff]  ;;  %v297_v41 = vld [vmem:[%s1396_s7 + $0x188] sm:$0xff] }
  0x3e   : > { %1001 = vmatpush.msra.mxu2 %v321_v6  ;;  %1002 = vmatpush.msra.mxu3 %v321_v6  ;;  %v272_v39 = vld [vmem:[%s1396_s7 + $0xc0] sm:$0xff]  ;;  %v257_v42 = vld [vmem:[%s1396_s7 + $0x48] sm:$0xff]  ;;  %v286_v44 = vld [vmem:[%s1396_s7 + $0x130] sm:$0xff] }
  0x3f   : > { %339 = vmatpush.msra.mxu0 %v320_v7  ;;  %1003 = vmatpush.msra.mxu1 %v320_v7  ;;  %v273_v43 = vld [vmem:[%s1396_s7 + $0xc8] sm:$0xff]  ;;  %v298_v45 = vld [vmem:[%s1396_s7 + $0x190] sm:$0xff]  ;;  %v287_v48 = vld [vmem:[%s1396_s7 + $0x138] sm:$0xff] }
  0x40   : > { %1004 = vmatpush.msra.mxu2 %v320_v7  ;;  %1005 = vmatpush.msra.mxu3 %v320_v7  ;;  %v258_v46 = vld [vmem:[%s1396_s7 + $0x50] sm:$0xff]  ;;  %v299_v49 = vld [vmem:[%s1396_s7 + $0x198] sm:$0xff]  ;;  %v288_v52 = vld [vmem:[%s1396_s7 + $0x140] sm:$0xff] }
  0x41   : > { %340 = vmatpush.msra.mxu0 %v319_v8  ;;  %1006 = vmatpush.msra.mxu1 %v319_v8  ;;  %v274_v47 = vld [vmem:[%s1396_s7 + $0xd0] sm:$0xff]  ;;  %v259_v50 = vld [vmem:[%s1396_s7 + $0x58] sm:$0xff]  ;;  %v300_v53 = vld [vmem:[%s1396_s7 + $0x1a0] sm:$0xff] }
  0x42   : > { %1007 = vmatpush.msra.mxu2 %v319_v8  ;;  %1008 = vmatpush.msra.mxu3 %v319_v8  ;;  %v275_v51 = vld [vmem:[%s1396_s7 + $0xd8] sm:$0xff]  ;;  %v260_v54 = vld [vmem:[%s1396_s7 + $0x60] sm:$0xff]  ;;  %v289_v56 = vld [vmem:[%s1396_s7 + $0x148] sm:$0xff] }
  0x43   : > { %341 = vmatpush.msra.mxu0 %v318_v9  ;;  %1009 = vmatpush.msra.mxu1 %v318_v9  ;;  %v276_v55 = vld [vmem:[%s1396_s7 + $0xe0] sm:$0xff]  ;;  %v301_v57 = vld [vmem:[%s1396_s7 + $0x1a8] sm:$0xff]  ;;  %v290_v60 = vld [vmem:[%s1396_s7 + $0x150] sm:$0xff] }
  0x44   : > { %1010 = vmatpush.msra.mxu2 %v318_v9  ;;  %1011 = vmatpush.msra.mxu3 %v318_v9  ;;  %v261_v58 = vld [vmem:[%s1396_s7 + $0x68] sm:$0xff]  ;;  %v302_v61 = vld [vmem:[%s1396_s7 + $0x1b0] sm:$0xff]  ;;  %v291_v0 = vld [vmem:[%s1396_s7 + $0x158] sm:$0xff] }
  0x45   : > { %342 = vmatpush.msra.mxu0 %v317_v10  ;;  %1012 = vmatpush.msra.mxu1 %v317_v10  ;;  %v277_v59 = vld [vmem:[%s1396_s7 + $0xe8] sm:$0xff]  ;;  %v262_v62 = vld [vmem:[%s1396_s7 + $0x70] sm:$0xff]  ;;  %v303_v1 = vld [vmem:[%s1396_s7 + $0x1b8] sm:$0xff] }
  0x46   : > { %1013 = vmatpush.msra.mxu2 %v317_v10  ;;  %1014 = vmatpush.msra.mxu3 %v317_v10  ;;  %v278_v63 = vld [vmem:[%s1396_s7 + $0xf0] sm:$0xff]  ;;  %v263_v2 = vld [vmem:[%s1396_s7 + $0x78] sm:$0xff]  ;;  %v292_v4 = vld [vmem:[%s1396_s7 + $0x160] sm:$0xff] }
  0x47   : > { %343 = vmatpush.msra.mxu0 %v316_v11  ;;  %1015 = vmatpush.msra.mxu1 %v316_v11  ;;  %v279_v3 = vld [vmem:[%s1396_s7 + $0xf8] sm:$0xff]  ;;  %v304_v5 = vld [vmem:[%s1396_s7 + $0x1c0] sm:$0xff] }
  0x48   : > { %1016 = vmatpush.msra.mxu2 %v316_v11  ;;  %1017 = vmatpush.msra.mxu3 %v316_v11  ;;  %v1463_v6 = vld [vmem:[%s1989_s2] ss:$0 sm:$0xff]  ;;  %v293_v11 = vld [vmem:[%s1396_s7 + $0x168] sm:$0xff] }
  0x49   : > { %344 = vmatpush.msra.mxu0 %v315_v12  ;;  %1018 = vmatpush.msra.mxu1 %v315_v12 }
  0x4a   : > { %1019 = vmatpush.msra.mxu2 %v315_v12  ;;  %1020 = vmatpush.msra.mxu3 %v315_v12  ;;  %v305_v12 = vld [vmem:[%s1396_s7 + $0x1c8] sm:$0xff] }
  0x4b   : > { %345 = vmatpush.msra.mxu0 %v314_v13  ;;  %1021 = vmatpush.msra.mxu1 %v314_v13 }
  0x4c   : > { %1022 = vmatpush.msra.mxu2 %v314_v13  ;;  %1023 = vmatpush.msra.mxu3 %v314_v13 }
  0x4d   : > { %346 = vmatpush.msra.mxu0 %v313_v14  ;;  %1024 = vmatpush.msra.mxu1 %v313_v14 }
  0x4e   : > { %1025 = vmatpush.msra.mxu2 %v313_v14  ;;  %1026 = vmatpush.msra.mxu3 %v313_v14 }
  0x4f   : > { %347 = vmatpush.msra.mxu0 %v312_v15  ;;  %1027 = vmatpush.msra.mxu1 %v312_v15 }
  0x50   : > { %348 = vmatmul.f32.vlgmr.msra.gmra.mxu0 %v248_v16  ;;  %396 = vmatmul.f32.vlgmr.msra.gmra.mxu1 %v264_v17 }
  0x51   : > { %1028 = vmatpush.msra.mxu2 %v312_v15  ;;  %1029 = vmatpush.msra.mxu3 %v312_v15 }
  0x52   : > { %444 = vmatmul.f32.vlgmr.msra.gmra.mxu2 %v280_v24  ;;  %492 = vmatmul.f32.vlgmr.msra.gmra.mxu3 %v296_v37 }
  0x58   : > { %351 = vmatmul.f32.gmra.mxu0 %v249_v18  ;;  %399 = vmatmul.f32.gmra.mxu1 %v265_v19 }
  0x5a   : > { %447 = vmatmul.f32.gmra.mxu2 %v281_v27  ;;  %495 = vmatmul.f32.gmra.mxu3 %v297_v41 }
  0x60   : > { %354 = vmatmul.f32.gmra.mxu0 %v250_v20  ;;  %402 = vmatmul.f32.gmra.mxu1 %v266_v21  ;;  %v294_v20 = vld [vmem:[%s1396_s7 + $0x170] sm:$0xff] }
  0x61   : > { %v306_v21 = vld [vmem:[%s1396_s7 + $0x1d0] sm:$0xff] }
  0x62   : > { %450 = vmatmul.f32.gmra.mxu2 %v282_v30  ;;  %498 = vmatmul.f32.gmra.mxu3 %v298_v45  ;;  %v307_v30 = vld [vmem:[%s1396_s7 + $0x1d8] sm:$0xff] }
  0x68   : > { %357 = vmatmul.f32.gmra.mxu0 %v251_v22  ;;  %405 = vmatmul.f32.gmra.mxu1 %v267_v23 }
  0x6a   : > { %453 = vmatmul.f32.gmra.mxu2 %v283_v33  ;;  %501 = vmatmul.f32.gmra.mxu3 %v299_v49 }
  0x70   : > { %360 = vmatmul.f32.gmra.mxu0 %v252_v25  ;;  %408 = vmatmul.f32.gmra.mxu1 %v268_v26 }
  0x72   : > { %456 = vmatmul.f32.gmra.mxu2 %v284_v36  ;;  %504 = vmatmul.f32.gmra.mxu3 %v300_v53 }
  0x78   : > { %363 = vmatmul.f32.gmra.mxu0 %v253_v28  ;;  %411 = vmatmul.f32.gmra.mxu1 %v269_v29  ;;  %v295_v29 = vld [vmem:[%s1396_s7 + $0x178] sm:$0xff] }
  0x7a   : > { %459 = vmatmul.f32.gmra.mxu2 %v285_v40  ;;  %507 = vmatmul.f32.gmra.mxu3 %v301_v57 }
  0x80   : > { %366 = vmatmul.f32.gmra.mxu0 %v254_v31  ;;  %414 = vmatmul.f32.gmra.mxu1 %v270_v32 }
  0x82   : > { %462 = vmatmul.f32.gmra.mxu2 %v286_v44  ;;  %510 = vmatmul.f32.gmra.mxu3 %v302_v61 }
  0x88   : > { %369 = vmatmul.f32.gmra.mxu0 %v255_v34  ;;  %417 = vmatmul.f32.gmra.mxu1 %v271_v35 }
  0x8a   : > { %465 = vmatmul.f32.gmra.mxu2 %v287_v48  ;;  %513 = vmatmul.f32.gmra.mxu3 %v303_v1  ;;  %v309_v48 = vld [vmem:[%s1396_s7 + $0x1e8] sm:$0xff] }
  0x90   : > { %372 = vmatmul.f32.gmra.mxu0 %v256_v38  ;;  %420 = vmatmul.f32.gmra.mxu1 %v272_v39  ;;  %v308_v38 = vld [vmem:[%s1396_s7 + $0x1e0] sm:$0xff] }
  0x92   : > { %468 = vmatmul.f32.gmra.mxu2 %v288_v52  ;;  %516 = vmatmul.f32.gmra.mxu3 %v304_v5 }
  0x98   : > { %375 = vmatmul.f32.gmra.mxu0 %v257_v42  ;;  %423 = vmatmul.f32.gmra.mxu1 %v273_v43 }
  0x9a   : > { %471 = vmatmul.f32.gmra.mxu2 %v289_v56  ;;  %519 = vmatmul.f32.gmra.mxu3 %v305_v12  ;;  %v310_v56 = vld [vmem:[%s1396_s7 + $0x1f0] sm:$0xff] }
  0xa0   : > { %378 = vmatmul.f32.gmra.mxu0 %v258_v46  ;;  %426 = vmatmul.f32.gmra.mxu1 %v274_v47 }
  0xa2   : > { %474 = vmatmul.f32.gmra.mxu2 %v290_v60  ;;  %522 = vmatmul.f32.gmra.mxu3 %v306_v21 }
  0xa8   : > { %381 = vmatmul.f32.gmra.mxu0 %v259_v50  ;;  %429 = vmatmul.f32.gmra.mxu1 %v275_v51 }
  0xaa   : > { %477 = vmatmul.f32.gmra.mxu2 %v291_v0  ;;  %525 = vmatmul.f32.gmra.mxu3 %v307_v30 }
  0xb0   : > { %384 = vmatmul.f32.gmra.mxu0 %v260_v54  ;;  %432 = vmatmul.f32.gmra.mxu1 %v276_v55 }
  0xb2   : > { %480 = vmatmul.f32.gmra.mxu2 %v292_v4  ;;  %528 = vmatmul.f32.gmra.mxu3 %v308_v38 }
  0xb8   : > { %387 = vmatmul.f32.gmra.mxu0 %v261_v58  ;;  %435 = vmatmul.f32.gmra.mxu1 %v277_v59 }
  0xba   : > { %483 = vmatmul.f32.gmra.mxu2 %v293_v11  ;;  %531 = vmatmul.f32.gmra.mxu3 %v309_v48 }
  0xc0   : > { %390 = vmatmul.f32.gmra.mxu0 %v262_v62  ;;  %438 = vmatmul.f32.gmra.mxu1 %v278_v63  ;;  %v311_v63 = vld [vmem:[%s1396_s7 + $0x1f8] sm:$0xff] }
  0xc2   : > { %486 = vmatmul.f32.gmra.mxu2 %v294_v20  ;;  %534 = vmatmul.f32.gmra.mxu3 %v310_v56 }
  0xc8   : > { %393 = vmatmul.f32.gmra.mxu0 %v263_v2  ;;  %441 = vmatmul.f32.gmra.mxu1 %v279_v3 }
  0xca   : > { %489 = vmatmul.f32.gmra.mxu2 %v295_v29  ;;  %537 = vmatmul.f32.gmra.mxu3 %v311_v63 }
  0xcd   : > { %v349_v7 = vpop.f32.mrf.mxu0  ;;  %v397_v8 = vpop.f32.mrf.mxu1 }
  0xce   : > { %v350_v9 = vadd.f32 %v1463_v6, %v349_v7  ;;  %v1467_v10 = vadd.f32 %v1463_v6, %v397_v8 }
  0xd0   : > { %541 = vst [vmem:[%s1471_s30] sm:$0xff] %v350_v9  ;;  %v674_v17 = vmul.f32 %v350_v9, %v350_v9 }
  0xd1   : > { %557 = vst [vmem:[%s1471_s30 + $0x80] sm:$0xff] %v1467_v10 }
  0xd5   : > { %v352_v13 = vpop.f32.mrf.mxu0  ;;  %v400_v14 = vpop.f32.mrf.mxu1 }
  0xd6   : > { %v353_v15 = vadd.f32 %v1463_v6, %v352_v13  ;;  %v1480_v16 = vadd.f32 %v1463_v6, %v400_v14  ;;  %v445_v44 = vpop.f32.mrf.mxu2  ;;  %v493_v13 = vpop.f32.mrf.mxu3 }
  0xd7   : > { %v1509_v45 = vadd.f32 %v1463_v6, %v445_v44 }
  0xd8   : > { %542 = vst [vmem:[%s1471_s30 + $0x8] sm:$0xff] %v353_v15  ;;  %v605_v18 = vadd.f32 %v353_v15, %v350_v9  ;;  %v675_v19 = vmul.f32 %v353_v15, %v353_v15  ;;  %v1578_v15 = vadd.f32 %v1463_v6, %v493_v13 }
  0xd9   : > { %558 = vst [vmem:[%s1471_s30 + $0x88] sm:$0xff] %v1480_v16 }
  0xda   : > { %v738_v22 = vadd.f32 %v675_v19, %v674_v17  ;;  %573 = vst [vmem:[%s1471_s30 + $0x100] sm:$0xff] %v1509_v45 }
  0xdb   : > { %589 = vst [vmem:[%s1471_s30 + $0x180] sm:$0xff] %v1578_v15 }
  0xdd   : > { %v355_v23 = vpop.f32.mrf.mxu0  ;;  %v403_v24 = vpop.f32.mrf.mxu1 }
  0xde   : > { %v356_v25 = vadd.f32 %v1463_v6, %v355_v23  ;;  %v1489_v26 = vadd.f32 %v1463_v6, %v403_v24  ;;  %v448_v54 = vpop.f32.mrf.mxu2 }
  0xdf   : > { %v1528_v55 = vadd.f32 %v1463_v6, %v448_v54 }
  0xe0   : > { %543 = vst [vmem:[%s1471_s30 + $0x10] sm:$0xff] %v356_v25  ;;  %v606_v27 = vadd.f32 %v605_v18, %v356_v25  ;;  %v676_v28 = vmul.f32 %v356_v25, %v356_v25 }
  0xe1   : > { %559 = vst [vmem:[%s1471_s30 + $0x90] sm:$0xff] %v1489_v26 }
  0xe2   : > { %v739_v31 = vadd.f32 %v738_v22, %v676_v28  ;;  %574 = vst [vmem:[%s1471_s30 + $0x108] sm:$0xff] %v1528_v55  ;;  %v496_v22 = vpop.f32.mrf.mxu3 }
  0xe3   : > { %v1598_v24 = vadd.f32 %v1463_v6, %v496_v22 }
  0xe5   : > { %v358_v32 = vpop.f32.mrf.mxu0  ;;  %v406_v33 = vpop.f32.mrf.mxu1  ;;  %590 = vst [vmem:[%s1471_s30 + $0x188] sm:$0xff] %v1598_v24 }
  0xe6   : > { %v359_v34 = vadd.f32 %v1463_v6, %v358_v32  ;;  %v1498_v35 = vadd.f32 %v1463_v6, %v406_v33  ;;  %v451_v61 = vpop.f32.mrf.mxu2 }
  0xe7   : > { %v1544_v62 = vadd.f32 %v1463_v6, %v451_v61 }
  0xe8   : > { %544 = vst [vmem:[%s1471_s30 + $0x18] sm:$0xff] %v359_v34  ;;  %v607_v36 = vadd.f32 %v606_v27, %v359_v34  ;;  %v677_v37 = vmul.f32 %v359_v34, %v359_v34 }
  0xe9   : > { %560 = vst [vmem:[%s1471_s30 + $0x98] sm:$0xff] %v1498_v35 }
  0xea   : > { %v740_v39 = vadd.f32 %v739_v31, %v677_v37  ;;  %575 = vst [vmem:[%s1471_s30 + $0x110] sm:$0xff] %v1544_v62  ;;  %v499_v31 = vpop.f32.mrf.mxu3 }
  0xeb   : > { %v1618_v33 = vadd.f32 %v1463_v6, %v499_v31 }
  0xed   : > { %v361_v40 = vpop.f32.mrf.mxu0  ;;  %v409_v41 = vpop.f32.mrf.mxu1  ;;  %591 = vst [vmem:[%s1471_s30 + $0x190] sm:$0xff] %v1618_v33 }
  0xee   : > { %v362_v42 = vadd.f32 %v1463_v6, %v361_v40  ;;  %v1506_v43 = vadd.f32 %v1463_v6, %v409_v41  ;;  %v454_v4 = vpop.f32.mrf.mxu2 }
  0xef   : > { %v1560_v5 = vadd.f32 %v1463_v6, %v454_v4 }
  0xf0   : > { %545 = vst [vmem:[%s1471_s30 + $0x20] sm:$0xff] %v362_v42  ;;  %v1512_v46 = vadd.f32 %v607_v36, %v362_v42  ;;  %v678_v47 = vmul.f32 %v362_v42, %v362_v42 }
  0xf1   : > { %561 = vst [vmem:[%s1471_s30 + $0xa0] sm:$0xff] %v1506_v43 }
  0xf2   : > { %v1517_v49 = vadd.f32 %v740_v39, %v678_v47  ;;  %576 = vst [vmem:[%s1471_s30 + $0x118] sm:$0xff] %v1560_v5  ;;  %v502_v40 = vpop.f32.mrf.mxu3 }
  0xf3   : > { %v1636_v42 = vadd.f32 %v1463_v6, %v502_v40 }
  0xf5   : > { %v364_v50 = vpop.f32.mrf.mxu0  ;;  %v412_v51 = vpop.f32.mrf.mxu1  ;;  %592 = vst [vmem:[%s1471_s30 + $0x198] sm:$0xff] %v1636_v42 }
  0xf6   : > { %v1522_v52 = vadd.f32 %v1463_v6, %v364_v50  ;;  %v1525_v53 = vadd.f32 %v1463_v6, %v412_v51  ;;  %v457_v12 = vpop.f32.mrf.mxu2 }
  0xf7   : > { %v1575_v14 = vadd.f32 %v1463_v6, %v457_v12 }
  0xf8   : > { %546 = vst [vmem:[%s1471_s30 + $0x28] sm:$0xff] %v1522_v52  ;;  %v609_v63 = vadd.f32 %v1512_v46, %v1522_v52 }
  0xf9   : > { %562 = vst [vmem:[%s1471_s30 + $0xa8] sm:$0xff] %v1525_v53 }
  0xfa   : > { %577 = vst [vmem:[%s1471_s30 + $0x120] sm:$0xff] %v1575_v14  ;;  %v505_v54 = vpop.f32.mrf.mxu3 }
  0xfd   : > { %v367_v57 = vpop.f32.mrf.mxu0  ;;  %v415_v58 = vpop.f32.mrf.mxu1 }
  0xfe   : > { %v1538_v59 = vadd.f32 %v1463_v6, %v367_v57  ;;  %v1541_v60 = vadd.f32 %v1463_v6, %v415_v58  ;;  %v460_v21 = vpop.f32.mrf.mxu2  ;;  %v1653_v57 = vadd.f32 %v1463_v6, %v505_v54  ;;  %v679_v58 = vmul.f32 %v1522_v52, %v1522_v52 }
  0xff   : > { %v1595_v23 = vadd.f32 %v1463_v6, %v460_v21 }
 0x100   : > { %547 = vst [vmem:[%s1471_s30 + $0x30] sm:$0xff] %v1538_v59  ;;  %v680_v61 = vmul.f32 %v1538_v59, %v1538_v59 }
 0x101   : > { %563 = vst [vmem:[%s1471_s30 + $0xb0] sm:$0xff] %v1541_v60 }
 0x102   : > { %578 = vst [vmem:[%s1471_s30 + $0x128] sm:$0xff] %v1595_v23 }
 0x103   : > { %593 = vst [vmem:[%s1471_s30 + $0x1a0] sm:$0xff] %v1653_v57 }
 0x105   : > { %v370_v0 = vpop.f32.mrf.mxu0  ;;  %v418_v1 = vpop.f32.mrf.mxu1 }
 0x106   : > { %v1554_v2 = vadd.f32 %v1463_v6, %v370_v0  ;;  %v1557_v3 = vadd.f32 %v1463_v6, %v418_v1  ;;  %v463_v30 = vpop.f32.mrf.mxu2  ;;  %v742_v0 = vadd.f32 %v1517_v49, %v679_v58 }
 0x107   : > { %v1615_v32 = vadd.f32 %v1463_v6, %v463_v30 }
 0x108   : > { %548 = vst [vmem:[%s1471_s30 + $0x38] sm:$0xff] %v1554_v2  ;;  %v681_v1 = vmul.f32 %v1554_v2, %v1554_v2  ;;  %v743_v46 = vadd.f32 %v742_v0, %v680_v61 }
 0x109   : > { %564 = vst [vmem:[%s1471_s30 + $0xb8] sm:$0xff] %v1557_v3 }
 0x10a   : > { %579 = vst [vmem:[%s1471_s30 + $0x130] sm:$0xff] %v1615_v32  ;;  %v744_v22 = vadd.f32 %v743_v46, %v681_v1 }
 0x10d   : > { %v373_v7 = vpop.f32.mrf.mxu0  ;;  %v421_v8 = vpop.f32.mrf.mxu1 }
 0x10e   : > { %v1569_v9 = vadd.f32 %v1463_v6, %v373_v7  ;;  %v1572_v11 = vadd.f32 %v1463_v6, %v421_v8  ;;  %v466_v39 = vpop.f32.mrf.mxu2  ;;  %v610_v8 = vadd.f32 %v609_v63, %v1538_v59 }
 0x10f   : > { %v1633_v41 = vadd.f32 %v1463_v6, %v466_v39 }
 0x110   : > { %549 = vst [vmem:[%s1471_s30 + $0x40] sm:$0xff] %v1569_v9  ;;  %v682_v49 = vmul.f32 %v1569_v9, %v1569_v9  ;;  %v611_v59 = vadd.f32 %v610_v8, %v1554_v2 }
 0x111   : > { %565 = vst [vmem:[%s1471_s30 + $0xc0] sm:$0xff] %v1572_v11 }
 0x112   : > { %580 = vst [vmem:[%s1471_s30 + $0x138] sm:$0xff] %v1633_v41  ;;  %v745_v30 = vadd.f32 %v744_v22, %v682_v49 }
 0x115   : > { %v376_v17 = vpop.f32.mrf.mxu0  ;;  %v424_v18 = vpop.f32.mrf.mxu1 }
 0x116   : > { %v1589_v19 = vadd.f32 %v1463_v6, %v376_v17  ;;  %v1592_v20 = vadd.f32 %v1463_v6, %v424_v18  ;;  %v469_v51 = vpop.f32.mrf.mxu2  ;;  %v508_v18 = vpop.f32.mrf.mxu3 }
 0x117   : > { %v1650_v56 = vadd.f32 %v1463_v6, %v469_v51  ;;  %v1682_v21 = vadd.f32 %v1463_v6, %v508_v18 }
 0x118   : > { %550 = vst [vmem:[%s1471_s30 + $0x48] sm:$0xff] %v1589_v19 }
 0x119   : > { %566 = vst [vmem:[%s1471_s30 + $0xc8] sm:$0xff] %v1592_v20 }
 0x11a   : > { %581 = vst [vmem:[%s1471_s30 + $0x140] sm:$0xff] %v1650_v56 }
 0x11b   : > { %594 = vst [vmem:[%s1471_s30 + $0x1a8] sm:$0xff] %v1682_v21 }
 0x11d   : > { %v379_v25 = vpop.f32.mrf.mxu0  ;;  %v427_v27 = vpop.f32.mrf.mxu1 }
 0x11e   : > { %v1609_v28 = vadd.f32 %v1463_v6, %v379_v25  ;;  %v1612_v29 = vadd.f32 %v1463_v6, %v427_v27  ;;  %v472_v17 = vpop.f32.mrf.mxu2  ;;  %v683_v25 = vmul.f32 %v1589_v19, %v1589_v19  ;;  %v612_v27 = vadd.f32 %v611_v59, %v1569_v9 }
 0x11f   : > { %v1679_v52 = vadd.f32 %v1463_v6, %v472_v17 }
 0x120   : > { %551 = vst [vmem:[%s1471_s30 + $0x50] sm:$0xff] %v1609_v28  ;;  %v613_v31 = vadd.f32 %v612_v27, %v1589_v19  ;;  %v684_v2 = vmul.f32 %v1609_v28, %v1609_v28  ;;  %v511_v19 = vpop.f32.mrf.mxu3 }
 0x121   : > { %567 = vst [vmem:[%s1471_s30 + $0xd0] sm:$0xff] %v1612_v29  ;;  %v1707_v58 = vadd.f32 %v1463_v6, %v511_v19 }
 0x122   : > { %582 = vst [vmem:[%s1471_s30 + $0x148] sm:$0xff] %v1679_v52  ;;  %v614_v40 = vadd.f32 %v613_v31, %v1609_v28 }
 0x123   : > { %595 = vst [vmem:[%s1471_s30 + $0x1b0] sm:$0xff] %v1707_v58 }
 0x125   : > { %v382_v34 = vpop.f32.mrf.mxu0  ;;  %v430_v36 = vpop.f32.mrf.mxu1 }
 0x126   : > { %v383_v37 = vadd.f32 %v1463_v6, %v382_v34  ;;  %v1630_v38 = vadd.f32 %v1463_v6, %v430_v36  ;;  %v746_v34 = vadd.f32 %v745_v30, %v683_v25  ;;  %v475_v51 = vpop.f32.mrf.mxu2 }
 0x127   : > { %v1704_v54 = vadd.f32 %v1463_v6, %v475_v51  ;;  %v692_v51 = vmul.f32 %v1489_v26, %v1489_v26 }
 0x128   : > { %552 = vst [vmem:[%s1471_s30 + $0x58] sm:$0xff] %v383_v37  ;;  %v747_v61 = vadd.f32 %v746_v34, %v684_v2  ;;  %v615_v63 = vadd.f32 %v614_v40, %v383_v37  ;;  %v514_v25 = vpop.f32.mrf.mxu3  ;;  %v690_v34 = vmul.f32 %v1467_v10, %v1467_v10  ;;  %v691_v40 = vmul.f32 %v1480_v16, %v1480_v16 }
 0x129   : > { %568 = vst [vmem:[%s1471_s30 + $0xd8] sm:$0xff] %v1630_v38 }
 0x12a   : > { %583 = vst [vmem:[%s1471_s30 + $0x150] sm:$0xff] %v1704_v54 }
 0x12d   : > { %v385_v44 = vpop.f32.mrf.mxu0  ;;  %v433_v47 = vpop.f32.mrf.mxu1 }
 0x12e   : > { %v386_v48 = vadd.f32 %v1463_v6, %v385_v44  ;;  %v1647_v50 = vadd.f32 %v1463_v6, %v433_v47  ;;  %v685_v44 = vmul.f32 %v383_v37, %v383_v37  ;;  %v478_v22 = vpop.f32.mrf.mxu2 }
 0x12f   : > { %v1721_v27 = vadd.f32 %v1463_v6, %v478_v22 }
 0x130   : > { %553 = vst [vmem:[%s1471_s30 + $0x60] sm:$0xff] %v386_v48  ;;  %v686_v0 = vmul.f32 %v386_v48, %v386_v48  ;;  %v748_v28 = vadd.f32 %v747_v61, %v685_v44  ;;  %v616_v1 = vadd.f32 %v615_v63, %v386_v48  ;;  %v517_v63 = vpop.f32.mrf.mxu3 }
 0x131   : > { %569 = vst [vmem:[%s1471_s30 + $0xe0] sm:$0xff] %v1647_v50 }
 0x132   : > { %584 = vst [vmem:[%s1471_s30 + $0x158] sm:$0xff] %v1721_v27 }
 0x135   : > { %v388_v4 = vpop.f32.mrf.mxu0  ;;  %v436_v7 = vpop.f32.mrf.mxu1 }
 0x136   : > { %v389_v12 = vadd.f32 %v1463_v6, %v388_v4  ;;  %v1674_v13 = vadd.f32 %v1463_v6, %v436_v7  ;;  %v749_v7 = vadd.f32 %v748_v28, %v686_v0  ;;  %v1746_v28 = vadd.f32 %v1463_v6, %v517_v63 }
 0x138   : > { %554 = vst [vmem:[%s1471_s30 + $0x68] sm:$0xff] %v389_v12  ;;  %v687_v4 = vmul.f32 %v389_v12, %v389_v12  ;;  %v617_v8 = vadd.f32 %v616_v1, %v389_v12  ;;  %v1724_v12 = vadd.f32 %v1463_v6, %v514_v25  ;;  %v693_v1 = vmul.f32 %v1498_v35, %v1498_v35  ;;  %v520_v22 = vpop.f32.mrf.mxu3 }
 0x139   : > { %570 = vst [vmem:[%s1471_s30 + $0xe8] sm:$0xff] %v1674_v13  ;;  %v1768_v25 = vadd.f32 %v1463_v6, %v520_v22 }
 0x13a   : > { %v750_v49 = vadd.f32 %v749_v7, %v687_v4  ;;  %596 = vst [vmem:[%s1471_s30 + $0x1b8] sm:$0xff] %v1724_v12 }
 0x13b   : > { %597 = vst [vmem:[%s1471_s30 + $0x1c0] sm:$0xff] %v1746_v28 }
 0x13c   : > { %598 = vst [vmem:[%s1471_s30 + $0x1c8] sm:$0xff] %v1768_v25 }
 0x13d   : > { %v391_v36 = vpop.f32.mrf.mxu0  ;;  %v439_v39 = vpop.f32.mrf.mxu1 }
 0x13e   : > { %v392_v9 = vadd.f32 %v1463_v6, %v391_v36  ;;  %v1701_v47 = vadd.f32 %v1463_v6, %v439_v39 }
 0x140   : > { %555 = vst [vmem:[%s1471_s30 + $0x70] sm:$0xff] %v392_v9  ;;  %v688_v17 = vmul.f32 %v392_v9, %v392_v9  ;;  %v618_v37 = vadd.f32 %v617_v8, %v392_v9 }
 0x141   : > { %571 = vst [vmem:[%s1471_s30 + $0xf0] sm:$0xff] %v1701_v47 }
 0x142   : > { %v751_v30 = vadd.f32 %v750_v49, %v688_v17  ;;  %v695_v17 = vmul.f32 %v1525_v53, %v1525_v53 }
 0x145   : > { %v394_v18 = vpop.f32.mrf.mxu0  ;;  %v442_v46 = vpop.f32.mrf.mxu1 }
 0x146   : > { %v395_v59 = vadd.f32 %v1463_v6, %v394_v18  ;;  %v1718_v48 = vadd.f32 %v1463_v6, %v442_v46 }
 0x148   : > { %556 = vst [vmem:[%s1471_s30 + $0x78] sm:$0xff] %v395_v59  ;;  %v619_v31 = vadd.f32 %v618_v37, %v395_v59  ;;  %v689_v2 = vmul.f32 %v395_v59, %v395_v59 }
 0x149   : > { %572 = vst [vmem:[%s1471_s30 + $0xf8] sm:$0xff] %v1718_v48 }
 0x14a   : > { %v620_v36 = vadd.f32 %v619_v31, %v1467_v10  ;;  %v752_v39 = vadd.f32 %v751_v30, %v689_v2  ;;  %v481_v10 = vpop.f32.mrf.mxu2  ;;  %v697_v30 = vmul.f32 %v1557_v3, %v1557_v3 }
 0x14b   : > { %v1743_v0 = vadd.f32 %v1463_v6, %v481_v10 }
 0x14c   : > { %v621_v44 = vadd.f32 %v620_v36, %v1480_v16  ;;  %v753_v9 = vadd.f32 %v752_v39, %v690_v34  ;;  %v699_v36 = vmul.f32 %v1592_v20, %v1592_v20 }
 0x14d   : > { %585 = vst [vmem:[%s1471_s30 + $0x160] sm:$0xff] %v1743_v0 }
 0x14e   : > { %v622_v19 = vadd.f32 %v621_v44, %v1489_v26  ;;  %v754_v61 = vadd.f32 %v753_v9, %v691_v40  ;;  %v694_v26 = vmul.f32 %v1506_v43, %v1506_v43 }
 0x150   : > { %v623_v16 = vadd.f32 %v622_v19, %v1498_v35  ;;  %v755_v4 = vadd.f32 %v754_v61, %v692_v51  ;;  %v696_v35 = vmul.f32 %v1541_v60, %v1541_v60  ;;  %v523_v19 = vpop.f32.mrf.mxu3 }
 0x151   : > { %v1790_v61 = vadd.f32 %v1463_v6, %v523_v19 }
 0x152   : > { %v624_v7 = vadd.f32 %v623_v16, %v1506_v43  ;;  %v756_v8 = vadd.f32 %v755_v4, %v693_v1  ;;  %v484_v59 = vpop.f32.mrf.mxu2  ;;  %v702_v16 = vmul.f32 %v1647_v50, %v1647_v50 }
 0x153   : > { %v1765_v43 = vadd.f32 %v1463_v6, %v484_v59  ;;  %599 = vst [vmem:[%s1471_s30 + $0x1d0] sm:$0xff] %v1790_v61 }
 0x154   : > { %v757_v18 = vadd.f32 %v756_v8, %v694_v26  ;;  %v625_v46 = vadd.f32 %v624_v7, %v1525_v53  ;;  %v703_v7 = vmul.f32 %v1674_v13, %v1674_v13 }
 0x155   : > { %586 = vst [vmem:[%s1471_s30 + $0x168] sm:$0xff] %v1765_v43 }
 0x156   : > { %v626_v49 = vadd.f32 %v625_v46, %v1541_v60  ;;  %v758_v37 = vadd.f32 %v757_v18, %v695_v17  ;;  %v698_v60 = vmul.f32 %v1572_v11, %v1572_v11  ;;  %v704_v17 = vmul.f32 %v1701_v47, %v1701_v47 }
 0x157   : > { %v705_v18 = vmul.f32 %v1718_v48, %v1718_v48 }
 0x158   : > { %v627_v31 = vadd.f32 %v626_v49, %v1557_v3  ;;  %v759_v53 = vadd.f32 %v758_v37, %v696_v35  ;;  %v700_v3 = vmul.f32 %v1612_v29, %v1612_v29 }
 0x15a   : > { %v628_v2 = vadd.f32 %v627_v31, %v1572_v11  ;;  %v760_v34 = vadd.f32 %v759_v53, %v697_v30  ;;  %v487_v51 = vpop.f32.mrf.mxu2  ;;  %v707_v30 = vmul.f32 %v1528_v55, %v1528_v55 }
 0x15b   : > { %v1787_v11 = vadd.f32 %v1463_v6, %v487_v51 }
 0x15c   : > { %v629_v39 = vadd.f32 %v628_v2, %v1592_v20  ;;  %v761_v40 = vadd.f32 %v760_v34, %v698_v60  ;;  %v701_v20 = vmul.f32 %v1630_v38, %v1630_v38 }
 0x15d   : > { %587 = vst [vmem:[%s1471_s30 + $0x170] sm:$0xff] %v1787_v11 }
 0x15e   : > { %v630_v44 = vadd.f32 %v629_v39, %v1612_v29  ;;  %v762_v9 = vadd.f32 %v761_v40, %v699_v36 }
 0x160   : > { %v631_v10 = vadd.f32 %v630_v44, %v1630_v38  ;;  %v763_v63 = vadd.f32 %v762_v9, %v700_v3  ;;  %v711_v44 = vmul.f32 %v1595_v23, %v1595_v23 }
 0x162   : > { %v764_v1 = vadd.f32 %v763_v63, %v701_v20  ;;  %v632_v29 = vadd.f32 %v631_v10, %v1647_v50  ;;  %v490_v46 = vpop.f32.mrf.mxu2  ;;  %v526_v50 = vpop.f32.mrf.mxu3 }
 0x163   : > { %v1811_v35 = vadd.f32 %v1463_v6, %v490_v46  ;;  %v1814_v49 = vadd.f32 %v1463_v6, %v526_v50  ;;  %v717_v46 = vmul.f32 %v1721_v27, %v1721_v27 }
 0x164   : > { %v765_v4 = vadd.f32 %v764_v1, %v702_v16  ;;  %v633_v26 = vadd.f32 %v632_v29, %v1674_v13 }
 0x165   : > { %588 = vst [vmem:[%s1471_s30 + $0x178] sm:$0xff] %v1811_v35 }
 0x166   : > { %v766_v38 = vadd.f32 %v765_v4, %v703_v7  ;;  %v634_v8 = vadd.f32 %v633_v26, %v1701_v47  ;;  %v706_v47 = vmul.f32 %v1509_v45, %v1509_v45  ;;  %600 = vst [vmem:[%s1471_s30 + $0x1d8] sm:$0xff] %v1814_v49  ;;  %v715_v4 = vmul.f32 %v1679_v52, %v1679_v52 }
 0x168   : > { %v767_v37 = vadd.f32 %v766_v38, %v704_v17  ;;  %v635_v13 = vadd.f32 %v634_v8, %v1718_v48  ;;  %v708_v48 = vmul.f32 %v1544_v62, %v1544_v62 }
 0x16a   : > { %v636_v59 = vadd.f32 %v635_v13, %v1509_v45  ;;  %v768_v22 = vadd.f32 %v767_v37, %v705_v18  ;;  %v529_v34 = vpop.f32.mrf.mxu3  ;;  %v709_v45 = vmul.f32 %v1560_v5, %v1560_v5  ;;  %v718_v37 = vmul.f32 %v1743_v0, %v1743_v0 }
 0x16b   : > { %v1831_v36 = vadd.f32 %v1463_v6, %v529_v34 }
 0x16c   : > { %v637_v31 = vadd.f32 %v636_v59, %v1528_v55  ;;  %v769_v53 = vadd.f32 %v768_v22, %v706_v47  ;;  %v710_v55 = vmul.f32 %v1575_v14, %v1575_v14 }
 0x16d   : > { %601 = vst [vmem:[%s1471_s30 + $0x1e0] sm:$0xff] %v1831_v36 }
 0x16e   : > { %v638_v60 = vadd.f32 %v637_v31, %v1544_v62  ;;  %v770_v2 = vadd.f32 %v769_v53, %v707_v30  ;;  %v720_v30 = vmul.f32 %v1787_v11, %v1787_v11  ;;  %v721_v31 = vmul.f32 %v1811_v35, %v1811_v35 }
 0x170   : > { %v639_v39 = vadd.f32 %v638_v60, %v1560_v5  ;;  %v771_v40 = vadd.f32 %v770_v2, %v708_v48  ;;  %v712_v5 = vmul.f32 %v1615_v32, %v1615_v32 }
 0x172   : > { %v640_v3 = vadd.f32 %v639_v39, %v1575_v14  ;;  %v772_v62 = vadd.f32 %v771_v40, %v709_v45  ;;  %v532_v20 = vpop.f32.mrf.mxu3  ;;  %v713_v14 = vmul.f32 %v1633_v41, %v1633_v41 }
 0x173   : > { %v1848_v63 = vadd.f32 %v1463_v6, %v532_v20 }
 0x174   : > { %v773_v9 = vadd.f32 %v772_v62, %v710_v55  ;;  %v641_v51 = vadd.f32 %v640_v3, %v1595_v23  ;;  %v714_v23 = vmul.f32 %v1650_v56, %v1650_v56 }
 0x175   : > { %602 = vst [vmem:[%s1471_s30 + $0x1e8] sm:$0xff] %v1848_v63 }
 0x176   : > { %v642_v19 = vadd.f32 %v641_v51, %v1615_v32  ;;  %v774_v10 = vadd.f32 %v773_v9, %v711_v44 }
 0x178   : > { %v643_v1 = vadd.f32 %v642_v19, %v1633_v41  ;;  %v775_v29 = vadd.f32 %v774_v10, %v712_v5  ;;  %v716_v41 = vmul.f32 %v1704_v54, %v1704_v54 }
 0x17a   : > { %v644_v16 = vadd.f32 %v643_v1, %v1650_v56  ;;  %v776_v32 = vadd.f32 %v775_v29, %v713_v14  ;;  %v535_v17 = vpop.f32.mrf.mxu3 }
 0x17b   : > { %v1866_v18 = vadd.f32 %v1463_v6, %v535_v17 }
 0x17c   : > { %v645_v26 = vadd.f32 %v644_v16, %v1679_v52  ;;  %v777_v7 = vadd.f32 %v776_v32, %v714_v23 }
 0x17d   : > { %603 = vst [vmem:[%s1471_s30 + $0x1f0] sm:$0xff] %v1866_v18 }
 0x17e   : > { %v646_v38 = vadd.f32 %v645_v26, %v1704_v54  ;;  %v778_v8 = vadd.f32 %v777_v7, %v715_v4 }
 0x180   : > { %v647_v56 = vadd.f32 %v646_v38, %v1721_v27  ;;  %v779_v50 = vadd.f32 %v778_v8, %v716_v41  ;;  %v719_v27 = vmul.f32 %v1765_v43, %v1765_v43 }
 0x182   : > { %v780_v52 = vadd.f32 %v779_v50, %v717_v46  ;;  %v648_v54 = vadd.f32 %v647_v56, %v1743_v0  ;;  %v538_v0 = vpop.f32.mrf.mxu3 }
 0x183   : > { %v1889_v53 = vadd.f32 %v1463_v6, %v538_v0 }
 0x184   : > { %v781_v13 = vadd.f32 %v780_v52, %v718_v37  ;;  %v649_v47 = vadd.f32 %v648_v54, %v1765_v43  ;;  %v722_v43 = vmul.f32 %v1578_v15, %v1578_v15 }
 0x185   : > { %604 = vst [vmem:[%s1471_s30 + $0x1f8] sm:$0xff] %v1889_v53 }
 0x186   : > { %v782_v59 = vadd.f32 %v781_v13, %v719_v27  ;;  %v650_v22 = vadd.f32 %v649_v47, %v1787_v11 }
 0x188   : > { %v783_v48 = vadd.f32 %v782_v59, %v720_v30  ;;  %v651_v60 = vadd.f32 %v650_v22, %v1811_v35 }
 0x18a   : > { %v652_v11 = vadd.f32 %v651_v60, %v1578_v15  ;;  %v784_v2 = vadd.f32 %v783_v48, %v721_v31 }
 0x18b   : > { %1184 = shalt.err (!%p1181_p10)
}
 0x18c   : > { %s1264_s26 = smov 128   ;;  %s1265_s30 = smov 8   ;;  %v723_v6 = vmul.f32 %v1598_v24, %v1598_v24  ;;  %v653_v15 = vadd.f32 %v652_v11, %v1598_v24  ;;  %v785_v35 = vadd.f32 %v784_v2, %v722_v43  ;;  %v724_v34 = vmul.f32 %v1618_v33, %v1618_v33 }
 0x18d   : > { %1036 = dma.vmem_to_hbm [thread:$0]  (%p1360_p3), %s829_s28, 8192, %s831_s11, %s811_s13, %s1264_s26, %s1264_s26, %s1265_s30   ;;  %v725_v40 = vmul.f32 %v1636_v42, %v1636_v42  ;;  %v726_v62 = vmul.f32 %v1653_v57, %v1653_v57  ;;  %v727_v24 = vmul.f32 %v1682_v21, %v1682_v21  ;;  %v733_v26 = vmul.f32 %v1814_v49, %v1814_v49 }
 0x18e   : > { %v654_v45 = vadd.f32 %v653_v15, %v1618_v33  ;;  %v786_v39 = vadd.f32 %v785_v35, %v723_v6  ;;  %v728_v33 = vmul.f32 %v1707_v58, %v1707_v58  ;;  %v734_v38 = vmul.f32 %v1831_v36, %v1831_v36  ;;  %s972_s5 = sshll.u32 %s1390_s10, 1  ;;  %s977_s23 = sshll.u32 %s1312_s19, 1 }
 0x18f   : > { %v737_v46 = vmul.f32 %v1889_v53, %v1889_v53  ;;  %s843_s28 = scalar_lea.hbm %s1991_s4, %s977_s23  ;;  %s245_s11 = scalar_lea.vmem [#allocation8], %s972_s5  ;;  %vm807_vm0 = vcmask 1040384  }
 0x190   : > { %v655_v55 = vadd.f32 %v654_v45, %v1636_v42  ;;  %v787_v3 = vadd.f32 %v786_v39, %v724_v34  ;;  %v729_v42 = vmul.f32 %v1724_v12, %v1724_v12  ;;  %s845_s13 = sshll.u32 %s245_s11, 4  ;;  %s847_s12 = sshll.u32 %s843_s28, 4  ;;  %s846_s13 = int_to_ptr.vmem [resolvable:$true] %s845_s13  ;;  %s848_s12 = int_to_ptr.hbm [resolvable:$true] %s847_s12 }
 0x191   : > { %s816_s19 = scalar_lea.sflag [#allocation9], %s1390_s10  ;;  %s1199_s14 = sshra.s32 %s848_s12, 4  ;;  %s1200_s14 = int_to_ptr.hbm [resolvable:$true] %s1199_s14 }
 0x192   : > { %v656_v44 = vadd.f32 %v655_v55, %v1653_v57  ;;  %v788_v9 = vadd.f32 %v787_v3, %v725_v40  ;;  %v730_v57 = vmul.f32 %v1746_v28, %v1746_v28  ;;  %s1201_s20 = scalar_lea.hbm %s1200_s14, 2  ;;  %s1205_s7 = scalar_lea.hbm %s1991_s4, 4 }
 0x193   : > { %p1202_p12 = scmp.ne.s32.totalorder %s1200_s14, %s1201_s20  ;;  %p1206_p5 = scmp.lt.s32.totalorder %s1200_s14, %s1991_s4 }
 0x194   : > { %v789_v51 = vadd.f32 %v788_v9, %v726_v62  ;;  %v657_v5 = vadd.f32 %v656_v44, %v1682_v21  ;;  %v731_v21 = vmul.f32 %v1768_v25, %v1768_v25  ;;  %p1207_p7 = scmp.lt.s32.totalorder %s1205_s7, %s1201_s20 }
 0x195   : > { %p1203_p13 = pnand %p1202_p12, %p1360_p3 }
 0x196   : > { %v658_v19 = vadd.f32 %v657_v5, %v1707_v58  ;;  %v790_v10 = vadd.f32 %v789_v51, %v727_v24  ;;  %v732_v58 = vmul.f32 %v1790_v61, %v1790_v61  ;;  %p1208_p1 = por %p1207_p7, %p1206_p5 }
 0x197   : > { %p1204_p0 = pneg %p1203_p13 }
 0x198   : > { %v659_v20 = vadd.f32 %v658_v19, %v1724_v12  ;;  %v791_v14 = vadd.f32 %v790_v10, %v728_v33 }
 0x199   : > { %p1209_p4 = pnand %p1208_p1, %p1204_p0 }
 0x19a   : > { %v660_v1 = vadd.f32 %v659_v20, %v1746_v28  ;;  %v792_v29 = vadd.f32 %v791_v14, %v729_v42 }
 0x19c   : > { %v661_v23 = vadd.f32 %v660_v1, %v1768_v25  ;;  %v793_v16 = vadd.f32 %v792_v29, %v730_v57 }
 0x19e   : > { %v662_v32 = vadd.f32 %v661_v23, %v1790_v61  ;;  %v794_v4 = vadd.f32 %v793_v16, %v731_v21  ;;  %v735_v61 = vmul.f32 %v1848_v63, %v1848_v63 }
 0x1a0   : > { %v663_v12 = vadd.f32 %v662_v32, %v1814_v49  ;;  %v795_v7 = vadd.f32 %v794_v4, %v732_v58  ;;  %v736_v49 = vmul.f32 %v1866_v18, %v1866_v18 }
 0x1a2   : > { %v796_v28 = vadd.f32 %v795_v7, %v733_v26  ;;  %v664_v41 = vadd.f32 %v663_v12, %v1831_v36 }
 0x1a4   : > { %v797_v25 = vadd.f32 %v796_v28, %v734_v38  ;;  %v665_v8 = vadd.f32 %v664_v41, %v1848_v63 }
 0x1a6   : > { %v798_v17 = vadd.f32 %v797_v25, %v735_v61  ;;  %v666_v56 = vadd.f32 %v665_v8, %v1866_v18 }
 0x1a8   : > { %v799_v50 = vadd.f32 %v798_v17, %v736_v49  ;;  %v667_v36 = vadd.f32 %v666_v56, %v1889_v53 }
 0x1aa   : > { %v668_v52 = vrot.slane %v667_v36, 4  ;;  %v800_v54 = vadd.f32 %v799_v50, %v737_v46 }
 0x1ac   : > { %v669_v37 = vadd.f32 %v668_v52, %v667_v36  ;;  %v801_v13 = vrot.slane %v800_v54, 4 }
 0x1ae   : > { %v670_v47 = vrot.slane %v669_v37, 2  ;;  %v802_v27 = vadd.f32 %v801_v13, %v800_v54 }
 0x1b0   : > { %v671_v63 = vadd.f32 %v670_v47, %v669_v37  ;;  %v803_v59 = vrot.slane %v802_v27, 2 }
 0x1b2   : > { %v672_v18 = vrot.slane %v671_v63, 1  ;;  %v804_v22 = vadd.f32 %v803_v59, %v802_v27 }
 0x1b4   : > { %v805_v30 = vrot.slane %v804_v22, 1  ;;  %v673_v31 = vadd.f32 %v672_v18, %v671_v63 }
 0x1b6   : > { %v806_v0 = vadd.f32 %v805_v30, %v804_v22 }
 0x1b8   : > { %v808_v53 = vsel %vm807_vm0, %v673_v31, %v806_v0 }
 0x1b9   : > { %809 = vst [vmem:[%s245_s11] sm:$0x3] %v808_v53 }
 0x1ba   : > { %1212 = shalt.err (!%p1209_p4)
}
 0x1bb   : > { %1037 = dma.vmem_to_hbm [thread:$0]  (%p1360_p3), %s846_s13, 32, %s848_s12, %s816_s19  }
 0x1bc PF: > { %s859_s10 = sand.u32 1, %s1247_s15   ;;  %p1997_p8 = scmp.ge.s32.totalorder %s1259_s18, 2 }
 0x1bd   : > { %s860_s30 = scalar_lea.sflag [#allocation4], %s859_s10 }
 0x1be   : > { %p1049_p11 = pnand %p1997_p8, %p1326_p6 }
 0x1c0   : > { %p1050_p9 = pneg %p1049_p11 }
 0x1c2   : > { %1238 = dma.done.wait (%p1050_p9), %s860_s30, 8192  }
 0x1c3   : > { %1240 = vsyncadd (%p1050_p9), %s860_s30, 4294959104  ;;  %s870_s5 = scalar_lea.sflag [#allocation9], %s859_s10 }
 0x1c4   : > { %1242 = dma.done.wait (%p1050_p9), %s870_s5, 32  }
 0x1c5   : > { %1244 = vsyncadd (%p1050_p9), %s870_s5, 4294967264  ;;  %p22_p3 = scmp.ge.s32.totalorder %s1344_s29, 4   ;;  %s1998_s15 = smov %s1251_s16 }
 0x1c6   : > { %s1999_s16 = smov %s1255_s17  ;;  %s2000_s17 = smov %s1356_s8 }
 0x1c7   : > { %s2001_s18 = smov %s1344_s29  ;;  %24 = sbr.rel (!%p22_p3) target bundleno = 8 (0x8), region = 98 }
 0x1cc   :  { %876 = vsyncpa [#allocation3], 1 }
 0x1cd   :  { %878 = vsyncpa [#allocation3 + $0x1], 1 }
 0x1ce   :  { %879 = vsyncpa [#allocation6], 1 }
 0x1cf   :  { %880 = vsyncpa [#allocation4], 1 }
 0x1d0   :  { %882 = vsyncpa [#allocation4 + $0x1], 1 }
 0x1d1   :  { %883 = vsyncpa [#allocation9], 1 }
 0x1d2   :  { %885 = vsyncpa [#allocation9 + $0x1], 1 }

</bundles_post_ra>
